<compile_context>
chip_gen: v7x
topology: tpu7x:2x2x1
jax: 0.10.0
libtpu: 0.0.40
codegen_flags: <defaults>
</compile_context>

<pallas_src>
import jax
import jax.numpy as jnp
from jax.experimental import pallas as pl
from jax.experimental.pallas import tpu as pltpu


def _round_up(x, m):
    return ((x + m - 1) // m) * m


# ---------------------------------------------------------------------------
# Pallas kernel: one row-tile of the patch GEMM + bias add.
# ---------------------------------------------------------------------------
def _patch_gemm_kernel(p_ref, w_ref, b_ref, o_ref):
    # p_ref: (TM, K)    bf16   im2col'd patch rows for this tile
    # w_ref: (K, Cout)  bf16   conv weight reshaped to a GEMM matrix (resident)
    # b_ref: (1, Cout)  f32    conv bias (resident)
    # o_ref: (TM, Cout) out_dtype
    y = jnp.dot(p_ref[...], w_ref[...], preferred_element_type=jnp.float32)
    o_ref[...] = (y + b_ref[...]).astype(o_ref.dtype)


# ---------------------------------------------------------------------------
# Wrapper: im2col (layout plumbing) + row-tiled pallas_call + token prepend.
# ---------------------------------------------------------------------------
def patch_layer_pallas(x, params, *, patch_size, add_token=True, out_dtype=None):
    B, Cin, H, W = x.shape
    P = patch_size
    assert H % P == 0 and W % P == 0, "spatial dims must be divisible by patch_size"
    Hp, Wp = H // P, W // P
    S = Hp * Wp
    Cout = params["conv_w"].shape[0]
    K = Cin * P * P
    out_dtype = x.dtype if out_dtype is None else out_dtype

    # --- im2col (layout plumbing, done once in the wrapper) ----------------
    # Cast to bf16 FIRST so the transpose pass moves 2-byte data.
    # Column order (ci, i, j) matches conv_w.reshape(Cout, Cin*P*P);
    # row order (b, hp, wp) matches 'B C H W -> B (H W) C'.
    xb = x.astype(jnp.bfloat16)
    patches = xb.reshape(B, Cin, Hp, P, Wp, P).transpose(0, 2, 4, 1, 3, 5)
    patches = patches.reshape(B * S, K)                       # (rows, K) bf16

    rows = B * S
    # Row-tile size: fill the MXU (512 rows) when there is enough work; for
    # small problems use the full (8-aligned, padded) row extent in one step.
    TM = 512 if rows > 512 else _round_up(rows, 8)
    rows_pad = _round_up(rows, TM)
    if rows_pad != rows:
        # Padded rows compute bias-only garbage and are sliced off below.
        patches = jnp.pad(patches, ((0, rows_pad - rows), (0, 0)))

    w_mat = params["conv_w"].reshape(Cout, K).T.astype(jnp.bfloat16)   # (K, Cout)
    bias = params["conv_b"].astype(jnp.float32).reshape(1, Cout)       # (1, Cout)

    grid = (rows_pad // TM,)
    out_itemsize = jnp.dtype(out_dtype).itemsize

    # Explicit VMEM budget: double-buffered in/out tiles + resident operands.
    vmem_needed = (2 * (TM * K * 2)                 # patches tile, bf16, x2 bufs
                   + 2 * (TM * Cout * out_itemsize)  # output tile, x2 bufs
                   + 2 * (K * Cout * 2)              # weight (double-buffered)
                   + 2 * (Cout * 4))                 # bias
    vmem_limit = min(max(int(vmem_needed * 1.5) + (2 << 20), 32 << 20), 96 << 20)

    cost = pl.CostEstimate(
        flops=2 * rows * K * Cout,
        transcendentals=0,
        bytes_accessed=int(patches.size * 2 + w_mat.size * 2 + bias.size * 4
                           + rows_pad * Cout * out_itemsize),
    )

    y = pl.pallas_call(
        _patch_gemm_kernel,
        out_shape=jax.ShapeDtypeStruct((rows_pad, Cout), out_dtype),
        grid=grid,
        in_specs=[
            pl.BlockSpec((TM, K), lambda i: (i, 0)),       # patch row tile
            pl.BlockSpec((K, Cout), lambda i: (0, 0)),     # weight: VMEM-resident
            pl.BlockSpec((1, Cout), lambda i: (0, 0)),     # bias:   VMEM-resident
        ],
        out_specs=pl.BlockSpec((TM, Cout), lambda i: (i, 0)),
        compiler_params=pltpu.CompilerParams(
            dimension_semantics=("parallel",),
            vmem_limit_bytes=vmem_limit),
        cost_estimate=cost,
    )(patches, w_mat, bias)

    y = y[:rows].reshape(B, S, Cout)                         # (B, S, Cout)

    if add_token:
        # Cheap (B, 1, Cout) prepend handled outside the kernel.
        tok = params["token"].reshape(1, 1, Cout).astype(out_dtype)
        tok = jnp.broadcast_to(tok, (B, 1, Cout))
        y = jnp.concatenate([tok, y], axis=1)                # (B, S+1, Cout)
    return y


# ---------------------------------------------------------------------------
# Pure-JAX reference (mirrors the PyTorch forward literally, for validation)
# ---------------------------------------------------------------------------
def patch_layer_ref(x, params, *, patch_size, add_token=True):
    P = patch_size
    out = jax.lax.conv_general_dilated(
        x, params["conv_w"], window_strides=(P, P), padding="VALID",
        dimension_numbers=("NCHW", "OIHW", "NCHW"))
    out = out + params["conv_b"][None, :, None, None]
    B, C, Hp, Wp = out.shape
    out = out.reshape(B, C, Hp * Wp).transpose(0, 2, 1)      # B (H W) C
    if add_token:
        tok = jnp.broadcast_to(params["token"].reshape(1, 1, C), (B, 1, C))
        out = jnp.concatenate([tok, out], axis=1)
    return out


# ---------------------------------------------------------------------------
if __name__ == "__main__":
    # Small shapes consistent with the module: B=2, Cin=4, 16x16 image,
    # patch_size=4 -> S = 16 patches, K = 64, Cout = 32, output (2, 17, 32).
    B, Cin, H, W = 2, 4, 16, 16
    Cout, P = 32, 4

    key = jax.random.PRNGKey(0)
    kx, kw, kb, kt = jax.random.split(key, 4)
    x = jax.random.normal(kx, (B, Cin, H, W), dtype=jnp.float32)
    params = {
        "conv_w": (0.05 * jax.random.normal(kw, (Cout, Cin, P, P))).astype(jnp.float32),
        "conv_b": (0.05 * jax.random.normal(kb, (Cout,))).astype(jnp.float32),
        "token": jax.random.uniform(kt, (1, 1, Cout), dtype=jnp.float32),
    }

    out = patch_layer_pallas(x, params, patch_size=P, add_token=True)
    out = jax.block_until_ready(out)

    ref = patch_layer_ref(x, params, patch_size=P, add_token=True)
    assert out.shape == (B, (H // P) * (W // P) + 1, Cout), out.shape
    max_err = float(jnp.max(jnp.abs(out - ref)))
    # bf16 MXU operands (patches + weight) with f32 accumulation -> tolerance
    # relaxed vs a pure-f32 conv.
    assert jnp.allclose(out, ref, rtol=2e-2, atol=2e-2), max_err
    print("KERNEL_OK")
</pallas_src>

<mosaic_0001>
module attributes {stable_mosaic.version = 11 : i64} {
  func.func @_patch_gemm_kernel(%arg0: i32, %arg1: memref<32x64xbf16, #tpu.memory_space<vmem>>, %arg2: memref<64x32xbf16, #tpu.memory_space<vmem>>, %arg3: memref<1x32xf32, #tpu.memory_space<vmem>>, %arg4: memref<32x32xf32, #tpu.memory_space<vmem>>) attributes {dimension_semantics = [#tpu.dimension_semantics<parallel>], iteration_bounds = array<i64: 1>, scalar_prefetch = 0 : i64, scratch_operands = 0 : i64, tpu.core_type = #tpu.core_type<tc>, window_params = [{transform_indices = @transform_0, window_bounds = array<i64: 32, 64>}, {pipeline_mode = #tpu.pipeline_mode<synchronous>, transform_indices = @transform_1, window_bounds = array<i64: 64, 32>}, {pipeline_mode = #tpu.pipeline_mode<synchronous>, transform_indices = @transform_2, window_bounds = array<i64: 1, 32>}, {transform_indices = @transform_3, window_bounds = array<i64: 32, 32>}]} {
    %c0 = arith.constant 0 : index
    %c0_0 = arith.constant 0 : index
    %0 = vector.load %arg1[%c0, %c0_0] : memref<32x64xbf16, #tpu.memory_space<vmem>>, vector<32x64xbf16>
    %c0_1 = arith.constant 0 : index
    %c0_2 = arith.constant 0 : index
    %1 = vector.load %arg2[%c0_1, %c0_2] : memref<64x32xbf16, #tpu.memory_space<vmem>>, vector<64x32xbf16>
    %cst = arith.constant dense<0.000000e+00> : vector<32x32xf32>
    %2 = tpu.matmul %0, %1, %cst {dimension_numbers = #tpu.dot_dimension_numbers<[1], [0], [0], [1], [0, 0, 1, 1], [], []>} : vector<32x64xbf16>, vector<64x32xbf16>, vector<32x32xf32> -> vector<32x32xf32>
    %c0_3 = arith.constant 0 : index
    %c0_4 = arith.constant 0 : index
    %3 = vector.load %arg3[%c0_3, %c0_4] : memref<1x32xf32, #tpu.memory_space<vmem>>, vector<1x32xf32>
    %4 = vector.broadcast %3 : vector<1x32xf32> to vector<32x32xf32>
    %5 = arith.addf %2, %4 : vector<32x32xf32>
    %c0_5 = arith.constant 0 : index
    %c0_6 = arith.constant 0 : index
    %6 = vector.load %arg4[%c0_5, %c0_6] : memref<32x32xf32, #tpu.memory_space<vmem>>, vector<32x32xf32>
    tpu.vector_store %arg4[%c0_5, %c0_6], %5 {strides = array<i32>} : memref<32x32xf32, #tpu.memory_space<vmem>>, vector<32x32xf32>,
    return
  }
  func.func @transform_0(%arg0: i32) -> (i32, i32) {
    %c0_i32 = arith.constant 0 : i32
    %c0_i32_0 = arith.constant 0 : i32
    return %arg0, %c0_i32 : i32, i32
  }
  func.func @transform_1(%arg0: i32) -> (i32, i32) {
    %c0_i32 = arith.constant 0 : i32
    %c0_i32_0 = arith.constant 0 : i32
    %c0_i32_1 = arith.constant 0 : i32
    return %c0_i32, %c0_i32_0 : i32, i32
  }
  func.func @transform_2(%arg0: i32) -> (i32, i32) {
    %c0_i32 = arith.constant 0 : i32
    %c0_i32_0 = arith.constant 0 : i32
    %c0_i32_1 = arith.constant 0 : i32
    return %c0_i32, %c0_i32_0 : i32, i32
  }
  func.func @transform_3(%arg0: i32) -> (i32, i32) {
    %c0_i32 = arith.constant 0 : i32
    %c0_i32_0 = arith.constant 0 : i32
    return %arg0, %c0_i32 : i32, i32
  }
}

</mosaic_0001>

<bundles_post_ra>
// kernel: tpu_custom_call.1
= control target key start
LH: loop header
LB: loop body
LE: loop exit
PB: predicated region body
PF: predicated region fallthrough
CT: control target
= control target key end

     0   :  { %vm69_vm0 = vcmask 523264   ;;  %s262_s0 = inlined_call_operand.vmem [shape: bf16[32,64], index: 0, kind: input, shape index: {}]   ;;  %s263_s1 = inlined_call_operand.vmem [shape: bf16[64,32], index: 1, kind: input, shape index: {}]   ;;  %s264_s2 = inlined_call_operand.vmem [shape: f32[1,32], index: 2, kind: input, shape index: {}]   ;;  %s265_s3 = inlined_call_operand.hbm [shape: f32[32,32], index: 3, kind: output, shape index: {}]  }
   0x1   :  { %v176_v0 = vld [vmem:[%s263_s1] sm:$0xff]   ;;  %v177_v1 = vld [vmem:[%s263_s1 + $0x8] sm:$0xff]   ;;  %v178_v2 = vld [vmem:[%s263_s1 + $0x10] sm:$0xff]  }
   0x2   :  { %161 = vmatprep.subr.bf16.mxu0 %v176_v0  ;;  %v180_v3 = vld [vmem:[%s262_s0] sm:$0xff]  }
   0x3   :  { %162 = vmatpush3.bf16.msra.mxu0 %v176_v0  ;;  %169 = vmatprep.mubr.msk.bf16.mxu0 %vm69_vm0, %v180_v3 }
   0x4   :  { %163 = vmatprep.subr.bf16.mxu0 %v177_v1 }
   0x5   :  { %8 = vsyncpa [#allocation3], 0  ;;  %v179_v4 = vld [vmem:[%s263_s1 + $0x18] sm:$0xff]   ;;  %v181_v5 = vld [vmem:[%s262_s0 + $0x8] sm:$0xff]   ;;  %vm125_vm1 = vcmask 261120   ;;  %s206_s26 = smov [#allocation2]  }
   0x6   :  { %v146_v6 = vld [vmem:[%s264_s2] ss:$0 sm:$0xff]  ;;  %s135_s27 = sshll.u32 %s206_s26, 4  ;;  %s136_s27 = int_to_ptr.vmem [resolvable:$true] %s135_s27 }
   0x7   :  { %164 = vmatpush3.bf16.msra.mxu0 %v177_v1  ;;  %s182_s0 = scalar_lea.vmem %s136_s27, 512  ;;  %p187_p1 = scmp.lt.s32.totalorder %s136_s27, %s136_s27 }
   0x8   :  { %165 = vmatprep.subr.bf16.mxu0 %v178_v2  ;;  %p183_p0 = scmp.ne.s32.totalorder %s136_s27, %s182_s0  ;;  %p188_p2 = scmp.lt.s32.totalorder %s182_s0, %s182_s0 }
   0xa   :  { %p189_p3 = por %p188_p2, %p187_p1 }
   0xb   :  { %166 = vmatpush3.bf16.msra.mxu0 %v178_v2 }
   0xc   :  { %167 = vmatprep.subr.bf16.mxu0 %v179_v4  ;;  %p190_p4 = pnand %p189_p3, %p183_p0 }
   0xf   :  { %168 = vmatpush3.bf16.msra.mxu0 %v179_v4 }
  0x12   :  { %170 = vmatmul.mubr.msk.bf16.vlgmr.msra.gmra.mrb[0].mxu0 %vm69_vm0, %v181_v5 }
  0xe5   :  { %v171_v7 = vpop.f32.mrb[0].mxu0 }
  0xe6   :  { %v119_v8 = vadd.f32 %v171_v7, %v146_v6  ;;  %v110_v9 = vpop.f32.mrb[1].mxu0 }
  0xe7   :  { %v111_v10 = vadd.f32 %v146_v6, %v110_v9  ;;  %v172_v11 = vpop.f32.mrb[2].mxu0 }
  0xe8   :  { %128 = vst.msk [vmem:[#allocation2 + $0x10] sm:$0xff] %vm125_vm1, %v119_v8  ;;  %v122_v12 = vadd.f32 %v172_v11, %v146_v6  ;;  %v113_v13 = vpop.f32.mrb[3].mxu0 }
  0xe9   :  { %126 = vst.msk [vmem:[#allocation2] sm:$0xff] %vm125_vm1, %v111_v10  ;;  %v114_v14 = vadd.f32 %v146_v6, %v113_v13 }
  0xea   :  { %129 = vst.msk [vmem:[#allocation2 + $0x18] sm:$0xff] %vm125_vm1, %v122_v12 }
  0xeb   :  { %127 = vst.msk [vmem:[#allocation2 + $0x8] sm:$0xff] %vm125_vm1, %v114_v14 }
  0xec   :  { %193 = shalt.err (!%p190_p4)
}
  0xed   :  { %s194_s28 = scalar_lea.hbm %s265_s3, 512 }
  0xee   :  { %p195_p5 = scmp.ne.s32.totalorder %s265_s3, %s194_s28  ;;  %p198_p6 = scmp.lt.u32.totalorder %s194_s28, %s265_s3 }
  0xf0   :  { %p200_p7 = pnand %p198_p6, %p195_p5 }
  0xf2   :  { %203 = shalt.err (!%p200_p7)
}
  0xf3   :  { %s207_s6 = smov 128   ;;  %s208_s7 = smov 8  }
  0xf4   :  { %141 = dma.vmem_to_hbm [thread:$0]  %s136_s27, 512, %s265_s3, [#allocation3], %s207_s6, %s207_s6, %s208_s7  }
  0xf5   :  { %204 = dma.done.wait [#allocation3], 512  }
  0xf6   :  { %205 = vsyncadd [#allocation3], 4294966784 }
  0xf7   :  { %145 = vsyncpa [#allocation3], 1 }

</bundles_post_ra>
